<compile_context>
chip_gen: v6e
topology: v6e:2x2x1
jax: 0.10.0
libtpu: 0.0.40
codegen_flags: <defaults>
</compile_context>

<pallas_src>
import functools

import jax
import jax.numpy as jnp
from jax.experimental import pallas as pl
from jax.experimental.pallas import tpu as pltpu

# Module hyper-parameters (from __init__ defaults).
GAMMA_NEG = 4          # pow-free rewrite below hardcodes these integer defaults
GAMMA_POS = 1
CLIP = 0.05
ALPHA = 0.25
EPS = 1e-8             # defined by the module but unused in its forward()


# ---------------------------------------------------------------------------
# Shared element-wise math
# ---------------------------------------------------------------------------
def _asl_elementwise(x, y):
    """Per-element asymmetric loss with focusing weight applied (binary y).

    Returns (loss, is_pos). Equivalent to the PyTorch forward for y in {0,1};
    jnp.power and the dead log branch are eliminated (EUP relief), and 1-x is
    reused between xs_neg and the positive-branch weight (VPU trim).
    """
    is_pos = y == 1.0
    one_minus_x = 1.0 - x
    # xs_neg = clamp(1 - x + clip, 1e-4, 1 - 1e-4)   (module clamps both ends)
    xs_neg = jnp.clip(one_minus_x + CLIP, 1e-4, 1.0 - 1e-4)

    # Fused log: for binary y only the selected operand ever contributes.
    logv = jnp.log(jnp.where(is_pos, x, xs_neg))
    loss = jnp.where(is_pos, ALPHA, 1.0 - ALPHA) * logv

    # Asymmetric focusing without jnp.power (pure VPU muls + selects):
    #   y == 1 : (1 - x)^GAMMA_POS        with GAMMA_POS == 1
    #   y == 0 : (1 - xs_neg)^GAMMA_NEG   with GAMMA_NEG == 4 (repeated squaring)
    base = jnp.where(is_pos, one_minus_x, 1.0 - xs_neg)
    b2 = base * base
    asym_w = jnp.where(is_pos, base, b2 * b2)
    return loss * asym_w, is_pos


# ---------------------------------------------------------------------------
# Chip-aware tuning helpers
# ---------------------------------------------------------------------------
def _sublane_multiple(dtype):
    # Native sublane tile height: f32 -> 8, bf16 -> 16, int8/bool -> 32.
    return max(8, 32 // jnp.dtype(dtype).itemsize)


def _chip_config():
    """Per-generation tuning: #TensorCores to parallelize over, per-input tile
    byte target, and the scoped-VMEM limit for the 2-input x 2-buffer pipeline."""
    kind = ""
    try:
        kind = jax.devices()[0].device_kind.lower()
    except Exception:  # pragma: no cover - defensive; fall through to default
        pass
    if "v7" in kind or "7x" in kind:
        # v7x: 2 TCs/chip, ~3.2 TB/s HBM, but only 64 MiB VMEM per TC.
        return {"num_parallel": 2, "tile_bytes": 4 << 20, "vmem_limit": 48 << 20}
    if "v6" in kind:
        # v6e: 1 TC, ~1.4 TB/s HBM, 128 MiB VMEM -> large tiles are free.
        return {"num_parallel": 1, "tile_bytes": 6 << 20, "vmem_limit": 64 << 20}
    if "v5" in kind:
        # v5e: 1 TC, ~0.82 TB/s; ~3 MiB tiles sit near roofline, but the scoped
        # VMEM default is only 16 MiB, so raise it for the double buffers.
        return {"num_parallel": 1, "tile_bytes": 3 << 20, "vmem_limit": 48 << 20}
    # Unknown / older generations (v2/v3 have only 16 MiB VMEM): stay modest.
    return {"num_parallel": 1, "tile_bytes": 1 << 20, "vmem_limit": None}


# ---------------------------------------------------------------------------
# Fast path: whole problem fits comfortably in VMEM -> single-shot kernel.
# ---------------------------------------------------------------------------
def _asl_small_kernel(x_ref, y_ref, out_ref):
    x = x_ref[...].astype(jnp.float32)
    y = y_ref[...].astype(jnp.float32)
    loss, is_pos = _asl_elementwise(x, y)

    loss_sum = jnp.sum(loss)
    neg_sum = jnp.sum(jnp.where(is_pos, 0.0, loss))   # loss * (1 - y), binary y
    num_pos = jnp.sum(y)                              # y.eq(1).sum() for binary y

    # if num_pos == 0: -(loss * (1 - y)).sum()   else: -loss.sum() / num_pos
    out_ref[0, 0] = jnp.where(num_pos == 0.0,
                              -neg_sum,
                              -loss_sum / jnp.maximum(num_pos, 1.0))


def _asl_small(x, y):
    out = pl.pallas_call(
        _asl_small_kernel,
        out_shape=jax.ShapeDtypeStruct((1, 1), jnp.float32),
        in_specs=[
            pl.BlockSpec(memory_space=pltpu.MemorySpace.VMEM),
            pl.BlockSpec(memory_space=pltpu.MemorySpace.VMEM),
        ],
        out_specs=pl.BlockSpec(memory_space=pltpu.MemorySpace.SMEM),
    )(x, y)
    return out[0, 0]


# ---------------------------------------------------------------------------
# Tiled path: grid = (num_parallel, row_tiles), double-buffered DMA pipeline.
# ---------------------------------------------------------------------------
def _asl_tiled_kernel(x_ref, y_ref, out_ref, acc_loss, acc_neg, acc_pos,
                      *, total_rows, needs_mask):
    t = pl.program_id(1)

    @pl.when(t == 0)
    def _():
        acc_loss[...] = jnp.zeros_like(acc_loss)
        acc_neg[...] = jnp.zeros_like(acc_neg)
        acc_pos[...] = jnp.zeros_like(acc_pos)

    x = x_ref[...].astype(jnp.float32)
    y = y_ref[...].astype(jnp.float32)
    loss, is_pos = _asl_elementwise(x, y)
    # loss * (1 - y) for binary y is just a select; y itself is the pos count.
    neg_loss = jnp.where(is_pos, 0.0, loss)
    posf = y

    def _accumulate(l, n, p):
        # Per-column partial sums only (sublane reduce per tile); the full
        # cross-lane collapse is deferred to the wrapper.
        acc_loss[...] += jnp.sum(l, axis=0, keepdims=True)
        acc_neg[...] += jnp.sum(n, axis=0, keepdims=True)
        acc_pos[...] += jnp.sum(p, axis=0, keepdims=True)

    if needs_mask:
        # Only edge / clamped-duplicate tiles pay for the row mask; interior
        # tiles take the unmasked branch (saves ~3 VPU ops/elem on them).
        tb = x_ref.shape[0]
        row0 = (pl.program_id(0) * pl.num_programs(1) + t) * tb
        is_edge = row0 + tb > total_rows

        @pl.when(is_edge)
        def _():
            rows = jax.lax.broadcasted_iota(jnp.int32, (tb, 1), 0) + row0
            valid = rows < total_rows
            # NOTE: keep these as *selects* (not multiplies): rows beyond the
            # array end hold undefined (possibly NaN) padded data.
            _accumulate(jnp.where(valid, loss, 0.0),
                        jnp.where(valid, neg_loss, 0.0),
                        jnp.where(valid, posf, 0.0))

        @pl.when(jnp.logical_not(is_edge))
        def _():
            _accumulate(loss, neg_loss, posf)
    else:
        _accumulate(loss, neg_loss, posf)

    @pl.when(t == pl.num_programs(1) - 1)
    def _():
        # Emit the per-column partials; the wrapper does the scalar collapse.
        out_ref[0, 0:1, :] = acc_loss[...]
        out_ref[0, 1:2, :] = acc_neg[...]
        out_ref[0, 2:3, :] = acc_pos[...]


def _asl_tiled(x, y, *, block_rows, num_parallel, vmem_limit_bytes=None):
    rows, width = x.shape

    # Round the tile rows to the packed-dtype sublane multiple of both inputs.
    sub = max(_sublane_multiple(x.dtype), _sublane_multiple(y.dtype))
    if rows <= sub:
        tb = rows                                   # single full-extent block
    else:
        tb = max(sub, min((block_rows // sub) * sub, (rows // sub) * sub))

    total_blocks = pl.cdiv(rows, tb)
    n_par = max(1, min(int(num_parallel), total_blocks))
    t_steps = pl.cdiv(total_blocks, n_par)
    # Mask whenever the (n_par * t_steps) x tb row coverage over-shoots `rows`
    # (partial last block and/or clamped duplicate blocks).
    needs_mask = (n_par * t_steps * tb) != rows

    def in_map(p, t):
        # Clamp so no block starts past the array end; duplicated steps are
        # fully zeroed by the in-kernel row mask.
        return (jnp.minimum(p * t_steps + t, total_blocks - 1), 0)

    kernel = functools.partial(_asl_tiled_kernel,
                               total_rows=rows, needs_mask=needs_mask)

    partials = pl.pallas_call(
        kernel,
        out_shape=jax.ShapeDtypeStruct((n_par, 3, width), jnp.float32),
        grid_spec=pltpu.PrefetchScalarGridSpec(
            num_scalar_prefetch=0,
            grid=(n_par, t_steps),
            in_specs=[
                pl.BlockSpec((tb, width), in_map),
                pl.BlockSpec((tb, width), in_map),
            ],
            out_specs=pl.BlockSpec((1, 3, width), lambda p, t: (p, 0, 0)),
            scratch_shapes=[pltpu.VMEM((1, width), jnp.float32)] * 3,
        ),
        compiler_params=pltpu.CompilerParams(
            dimension_semantics=("parallel", "arbitrary"),
            vmem_limit_bytes=vmem_limit_bytes),
    )(x, y)

    loss_sum = jnp.sum(partials[:, 0, :])
    neg_sum = jnp.sum(partials[:, 1, :])
    num_pos = jnp.sum(partials[:, 2, :])
    return jnp.where(num_pos == 0.0,
                     -neg_sum,
                     -loss_sum / jnp.maximum(num_pos, 1.0))


def asymmetric_loss_optimized(x, y, *, block_rows=None, num_parallel=None,
                              small_bytes=2 * 1024 * 1024):
    """x: [B, C] probabilities in (0, 1); y: [B, C] binarized targets in {0,1}.

    Returns the scalar f32 loss. Narrow input dtypes are accepted and
    recommended for large inputs (bf16 x, int8/bool y): the tiled path is
    HBM-bound so this cuts wall-clock ~proportionally; compute/accumulation
    stays f32.
    """
    B, C = x.shape
    total = B * C
    total_bytes = total * (x.dtype.itemsize + y.dtype.itemsize)
    if total_bytes <= small_bytes:
        # Tiny problem: grid-step overhead would dominate; single-shot kernel.
        return _asl_small(x, y)

    cfg = _chip_config()
    if num_parallel is None:
        num_parallel = cfg["num_parallel"]

    # Lane-dense view: when C under-fills the 128-wide vreg lanes (or is not a
    # lane multiple, e.g. C=80), reflatten (B, C) -> (rows, W) so every vreg
    # row and DMA line is full. Only when it divides exactly (no element tail).
    xv, yv = x, y
    if C % 128 != 0:
        for w in (512, 256, 128):
            if total % w == 0:
                xv = x.reshape(total // w, w)
                yv = y.reshape(total // w, w)
                break
    rows, width = xv.shape

    if block_rows is None:
        # Bytes-based tile sizing (per-chip target); no artificial row cap.
        block_rows = max(8, cfg["tile_bytes"] // (width * x.dtype.itemsize))

    return _asl_tiled(xv, yv, block_rows=block_rows, num_parallel=num_parallel,
                      vmem_limit_bytes=cfg["vmem_limit"])


# ---------------------------------------------------------------------------
# Pure-JAX reference transcribing the PyTorch forward (pow + 2 logs + clamps).
# ---------------------------------------------------------------------------
def _reference(x, y):
    x = x.astype(jnp.float32)
    y = y.astype(jnp.float32)
    anti = 1.0 - y
    xs_neg = jnp.clip(1.0 - x + CLIP, 1e-4, 1.0 - 1e-4)
    loss = ALPHA * y * jnp.log(x) + (1.0 - ALPHA) * anti * jnp.log(xs_neg)
    w = jnp.power(1.0 - x * y - xs_neg * anti,
                  GAMMA_POS * y + GAMMA_NEG * anti)
    loss = loss * w
    num_pos = jnp.sum((y == 1.0).astype(jnp.float32))
    return jnp.where(num_pos == 0.0,
                     -jnp.sum(loss * (1.0 - y)),
                     -jnp.sum(loss) / jnp.maximum(num_pos, 1.0))


if __name__ == "__main__":
    key = jax.random.PRNGKey(0)
    k1, k2, k3, k4, k5, k6 = jax.random.split(key, 6)

    # ---- Test 1: small problem -> single-shot fast path --------------------
    B1, C1 = 8, 128
    x1 = jax.nn.sigmoid(jax.random.normal(k1, (B1, C1), dtype=jnp.float32))
    y1 = (jax.random.uniform(k2, (B1, C1)) < 0.3).astype(jnp.float32)
    out1 = asymmetric_loss_optimized(x1, y1)
    jax.block_until_ready(out1)
    ref1 = _reference(x1, y1)
    assert jnp.allclose(out1, ref1, rtol=1e-5, atol=1e-5), (out1, ref1)

    # ---- Test 2: tiled path (forced), uneven tiling exercises edge masking -
    B2, C2 = 40, 256
    x2 = jax.nn.sigmoid(jax.random.normal(k3, (B2, C2), dtype=jnp.float32))
    y2 = (jax.random.uniform(k4, (B2, C2)) < 0.3).astype(jnp.float32)
    out2 = _asl_tiled(x2, y2, block_rows=16, num_parallel=2)
    jax.block_until_ready(out2)
    ref2 = _reference(x2, y2)
    assert jnp.allclose(out2, ref2, rtol=1e-5, atol=1e-5), (out2, ref2)

    # ---- Test 3: tiled path, num_pos == 0 branch ----------------------------
    y3 = jnp.zeros((B2, C2), dtype=jnp.float32)
    out3 = _asl_tiled(x2, y3, block_rows=16, num_parallel=2)
    jax.block_until_ready(out3)
    ref3 = _reference(x2, y3)
    assert jnp.allclose(out3, ref3, rtol=1e-5, atol=1e-5), (out3, ref3)

    # ---- Test 4: narrow dtypes + lane-dense flatten through the wrapper ----
    B4, C4 = 256, 80                      # C=80 -> reflattened to (rows, 512)
    x4 = jax.nn.sigmoid(jax.random.normal(k5, (B4, C4), dtype=jnp.float32))
    y4 = jax.random.uniform(k6, (B4, C4)) < 0.3
    out4 = asymmetric_loss_optimized(x4.astype(jnp.bfloat16),
                                     y4.astype(jnp.int8),
                                     small_bytes=0)   # force the tiled path
    jax.block_until_ready(out4)
    ref4 = _reference(x4.astype(jnp.bfloat16), y4.astype(jnp.float32))
    assert jnp.allclose(out4, ref4, rtol=1e-4, atol=1e-4), (out4, ref4)

    print("KERNEL_OK")
</pallas_src>

<mosaic_0001>
module attributes {stable_mosaic.version = 11 : i64} {
  func.func @_asl_small_kernel(%arg0: memref<8x128xf32, #tpu.memory_space<vmem>>, %arg1: memref<8x128xf32, #tpu.memory_space<vmem>>, %arg2: memref<1x1xf32, #tpu.memory_space<smem>>) attributes {dimension_semantics = [], scalar_prefetch = 0 : i64, scratch_operands = 0 : i64, tpu.core_type = #tpu.core_type<tc>} {
    %c0 = arith.constant 0 : index
    %c0_0 = arith.constant 0 : index
    %0 = vector.load %arg0[%c0, %c0_0] : memref<8x128xf32, #tpu.memory_space<vmem>>, vector<8x128xf32>
    %c0_1 = arith.constant 0 : index
    %c0_2 = arith.constant 0 : index
    %1 = vector.load %arg1[%c0_1, %c0_2] : memref<8x128xf32, #tpu.memory_space<vmem>>, vector<8x128xf32>
    %cst = arith.constant 1.000000e+00 : f32
    %2 = vector.broadcast %cst : f32 to vector<8x128xf32>
    %3 = arith.cmpf oeq, %1, %2 : vector<8x128xf32>
    %cst_3 = arith.constant 1.000000e+00 : f32
    %4 = vector.broadcast %cst_3 : f32 to vector<8x128xf32>
    %5 = arith.subf %4, %0 : vector<8x128xf32>
    %cst_4 = arith.constant 5.000000e-02 : f32
    %6 = vector.broadcast %cst_4 : f32 to vector<8x128xf32>
    %7 = arith.addf %5, %6 : vector<8x128xf32>
    %cst_5 = arith.constant 9.99999974E-5 : f32
    %cst_6 = arith.constant 0.999899983 : f32
    %8 = vector.broadcast %cst_5 : f32 to vector<8x128xf32>
    %9 = arith.maximumf %8, %7 : vector<8x128xf32>
    %10 = vector.broadcast %cst_6 : f32 to vector<8x128xf32>
    %11 = arith.minimumf %10, %9 : vector<8x128xf32>
    %12 = arith.select %3, %0, %11 : vector<8x128xi1>, vector<8x128xf32>
    %13 = math.log %12 : vector<8x128xf32>
    %cst_7 = arith.constant 2.500000e-01 : f32
    %cst_8 = arith.constant 7.500000e-01 : f32
    %14 = vector.broadcast %cst_7 : f32 to vector<8x128xf32>
    %15 = vector.broadcast %cst_8 : f32 to vector<8x128xf32>
    %16 = arith.select %3, %14, %15 : vector<8x128xi1>, vector<8x128xf32>
    %17 = arith.mulf %16, %13 : vector<8x128xf32>
    %cst_9 = arith.constant 1.000000e+00 : f32
    %18 = vector.broadcast %cst_9 : f32 to vector<8x128xf32>
    %19 = arith.subf %18, %11 : vector<8x128xf32>
    %20 = arith.select %3, %5, %19 : vector<8x128xi1>, vector<8x128xf32>
    %21 = arith.mulf %20, %20 : vector<8x128xf32>
    %22 = arith.mulf %21, %21 : vector<8x128xf32>
    %23 = arith.select %3, %20, %22 : vector<8x128xi1>, vector<8x128xf32>
    %24 = arith.mulf %17, %23 : vector<8x128xf32>
    %25 = vector.shape_cast %24 : vector<8x128xf32> to vector<1x8x128xf32>
    %cst_10 = arith.constant dense<0.000000e+00> : vector<1xf32>
    %26 = vector.multi_reduction <add>, %25, %cst_10 [1, 2] : vector<1x8x128xf32> to vector<1xf32>
    %27 = vector.shape_cast %26 : vector<1xf32> to vector<1x1x1xf32>
    %28 = vector.extract %27[0, 0, 0] : f32 from vector<1x1x1xf32>
    %cst_11 = arith.constant 0.000000e+00 : f32
    %29 = vector.broadcast %cst_11 : f32 to vector<8x128xf32>
    %30 = arith.select %3, %29, %24 : vector<8x128xi1>, vector<8x128xf32>
    %31 = vector.shape_cast %30 : vector<8x128xf32> to vector<1x8x128xf32>
    %cst_12 = arith.constant dense<0.000000e+00> : vector<1xf32>
    %32 = vector.multi_reduction <add>, %31, %cst_12 [1, 2] : vector<1x8x128xf32> to vector<1xf32>
    %33 = vector.shape_cast %32 : vector<1xf32> to vector<1x1x1xf32>
    %34 = vector.extract %33[0, 0, 0] : f32 from vector<1x1x1xf32>
    %35 = vector.shape_cast %1 : vector<8x128xf32> to vector<1x8x128xf32>
    %cst_13 = arith.constant dense<0.000000e+00> : vector<1xf32>
    %36 = vector.multi_reduction <add>, %35, %cst_13 [1, 2] : vector<1x8x128xf32> to vector<1xf32>
    %37 = vector.shape_cast %36 : vector<1xf32> to vector<1x1x1xf32>
    %38 = vector.extract %37[0, 0, 0] : f32 from vector<1x1x1xf32>
    %cst_14 = arith.constant 0.000000e+00 : f32
    %39 = arith.cmpf oeq, %38, %cst_14 : f32
    %cst_15 = arith.constant 0.000000e+00 : f32
    %40 = arith.subf %cst_15, %34 : f32
    %cst_16 = arith.constant 0.000000e+00 : f32
    %41 = arith.subf %cst_16, %28 : f32
    %cst_17 = arith.constant 1.000000e+00 : f32
    %42 = arith.maximumf %38, %cst_17 : f32
    %43 = arith.divf %41, %42 : f32
    %44 = arith.select %39, %40, %43 : f32
    %c0_18 = arith.constant 0 : index
    %c0_19 = arith.constant 0 : index
    %45 = memref.load %arg2[%c0_18, %c0_19] : memref<1x1xf32, #tpu.memory_space<smem>>
    memref.store %44, %arg2[%c0_18, %c0_19] : memref<1x1xf32, #tpu.memory_space<smem>>
    return
  }
}

</mosaic_0001>

<bundles_post_ra>
// kernel: tpu_custom_call.1
= control target key start
LH: loop header
LB: loop body
LE: loop exit
PB: predicated region body
PF: predicated region fallthrough
CT: control target
= control target key end

     0   :  { %7 = vsyncpa [#allocation3], 0  ;;  %s213_s0 = inlined_call_operand.hbm [shape: f32[8,128], index: 0, kind: input, shape index: {}]   ;;  %s214_s1 = inlined_call_operand.hbm [shape: f32[8,128], index: 1, kind: input, shape index: {}]   ;;  %s215_s2 = inlined_call_operand.hbm [shape: f32[1,1], index: 2, kind: output, shape index: {}]  }
   0x1   :  { %8 = vsyncpa [#allocation6], 0 }
   0x2   :  { %9 = vsyncpa [#allocation4], 0  ;;  %s179_s9 = smov [#allocation2]   ;;  %s180_s11 = smov [#allocation5]  }
   0x3   :  { %s16_s10 = sshll.u32 %s179_s9, 4  ;;  %s26_s12 = sshll.u32 %s180_s11, 4  ;;  %s17_s10 = int_to_ptr.vmem [resolvable:$true] %s16_s10  ;;  %s27_s12 = int_to_ptr.vmem [resolvable:$true] %s26_s12 }
   0x4   :  { %s133_s13 = scalar_lea.vmem %s17_s10, 128  ;;  %p138_p1 = scmp.lt.s32.totalorder %s17_s10, %s17_s10 }
   0x5   :  { %p134_p0 = scmp.ne.s32.totalorder %s17_s10, %s133_s13  ;;  %p139_p2 = scmp.lt.s32.totalorder %s133_s13, %s133_s13 }
   0x7   :  { %p140_p3 = por %p139_p2, %p138_p1 }
   0x9   :  { %p141_p4 = pnand %p140_p3, %p134_p0 }
   0xb   :  { %144 = shalt.err (!%p141_p4)
}
   0xc   :  { %19 = dma.hbm_to_vmem [thread:$0]  %s213_s0, 128, %s17_s10, [#allocation3]  }
   0xd   :  { %s153_s16 = scalar_lea.vmem %s27_s12, 128  ;;  %p158_p6 = scmp.lt.s32.totalorder %s27_s12, %s27_s12 }
   0xe   :  { %p154_p5 = scmp.ne.s32.totalorder %s27_s12, %s153_s16  ;;  %p159_p7 = scmp.lt.s32.totalorder %s153_s16, %s153_s16 }
  0x10   :  { %p160_p8 = por %p159_p7, %p158_p6 }
  0x12   :  { %p161_p9 = pnand %p160_p8, %p154_p5 }
  0x14   :  { %164 = shalt.err (!%p161_p9)
}
  0x15   :  { %29 = dma.hbm_to_vmem [thread:$0]  %s214_s1, 128, %s27_s12, [#allocation6]  }
  0x16   :  { %173 = dma.done.wait [#allocation3], 128  }
  0x17   :  { %174 = vsyncadd [#allocation3], 4294967168 }
  0x18   :  { %175 = dma.done.wait [#allocation6], 128  }
  0x19   :  { %176 = vsyncadd [#allocation6], 4294967168  ;;  %v37_v0 = vld [vmem:[#allocation5] sm:$0xff]  ;;  %v36_v1 = vld [vmem:[#allocation2] sm:$0xff]  ;;  %v181_v12 = vmov 0.75   ;;  %s182_s20 = smov 1.0  }
  0x1a   :  { %73 = vadd.xlane.f32.xlu1 %v37_v0  ;;  %v39_v2 = vsub.f32 1.0, %v36_v1  ;;  %vm38_vm0 = vcmp.eq.f32.partialorder %v37_v0, 1.0  ;;  %s183_s26 = smov [#allocation7]  }
  0x1b   :  { %v46_v13 = vsel %vm38_vm0, 0.25, %v181_v12 }
  0x1c   :  { %v40_v3 = vadd.f32 0.05, %v39_v2 }
  0x1e   :  { %v41_v4 = vmax.f32 %v40_v3, 0.0001 }
  0x20   :  { %v42_v5 = vmin.f32 %v41_v4, 0.9999 }
  0x22   :  { %v43_v6 = vsel %vm38_vm0, %v36_v1, %v42_v5  ;;  %v48_v7 = vsub.f32 1.0, %v42_v5 }
  0x23   :  { %121 = vlog2.f32 %v43_v6 }
  0x24   :  { %v49_v8 = vsel %vm38_vm0, %v39_v2, %v48_v7 }
  0x25   :  { %v50_v9 = vmul.f32 %v49_v8, %v49_v8 }
  0x27   :  { %v51_v10 = vmul.f32 %v50_v9, %v50_v9 }
  0x29   :  { %v52_v15 = vsel %vm38_vm0, %v39_v2, %v51_v10 }
  0x30   :  { %v122_v11 = vpop.eup %121 }
  0x31   :  { %v45_v14 = vmul.f32 0.6931472, %v122_v11 }
  0x33   :  { %v47_v16 = vmul.f32 %v46_v13, %v45_v14 }
  0x35   :  { %v53_v17 = vmul.f32 %v52_v15, %v47_v16 }
  0x37   :  { %54 = vadd.xlane.f32.xlu0 %v53_v17  ;;  %v63_v18 = vsel %vm38_vm0, 0.0, %v53_v17 }
  0x3b   :  { %64 = vadd.xlane.f32.xlu0 %v63_v18 }
  0xa3   :  { %v74_v19 = vpop.xlane.xlu1 %73 }
  0xa4   :  { %v75_v20 = vrot.slane %v74_v19, 4 }
  0xa6   :  { %v76_v21 = vadd.f32 %v75_v20, %v74_v19 }
  0xa8   :  { %v77_v25 = vrot.slane %v76_v21, 2 }
  0xaa   :  { %v78_v31 = vadd.f32 %v77_v25, %v76_v21 }
  0xac   :  { %v79_v36 = vrot.slane %v78_v31, 1 }
  0xae   :  { %v80_v39 = vadd.f32 %v79_v36, %v78_v31 }
  0xc0   :  { %v55_v22 = vpop.xlane.xlu0 %54 }
  0xc1   :  { %v56_v23 = vrot.slane %v55_v22, 4 }
  0xc3   :  { %v57_v24 = vadd.f32 %v56_v23, %v55_v22 }
  0xc4   :  { %v65_v26 = vpop.xlane.xlu0 %64 }
  0xc5   :  { %v58_v27 = vrot.slane %v57_v24, 2  ;;  %v66_v28 = vrot.slane %v65_v26, 4 }
  0xc7   :  { %v67_v29 = vadd.f32 %v66_v28, %v65_v26  ;;  %v59_v30 = vadd.f32 %v58_v27, %v57_v24 }
  0xc9   :  { %v68_v32 = vrot.slane %v67_v29, 2  ;;  %v60_v33 = vrot.slane %v59_v30, 1 }
  0xcb   :  { %v69_v34 = vadd.f32 %v68_v32, %v67_v29  ;;  %v61_v35 = vadd.f32 %v60_v33, %v59_v30 }
  0xcd   :  { %108 = vpush %v61_v35  ;;  %v70_v37 = vrot.slane %v69_v34, 1 }
  0xcf   :  { %v71_v38 = vadd.f32 %v70_v37, %v69_v34 }
  0xd1   :  { %110 = vpush %v71_v38 }
  0xd2   :  { %112 = vpush %v80_v39 }
  0xfe   :  { %s109_s0 = spop %108 }
  0xff   :  { %s84_s22 = ssub.f32 0.0, %s109_s0 }
 0x102   :  { %s111_s1 = spop %110 }
 0x103   :  { %s113_s19 = spop %112  ;;  %s83_s23 = ssub.f32 0.0, %s111_s1 }
 0x104   :  { %s85_s21 = smax.f32 %s182_s20, %s113_s19  ;;  %p82_p10 = scmp.eq.f32.partialorder %s113_s19, 0.0 }
 0x105   :  { %v86_v40 = vstv %s85_s21 }
 0x106   :  { %123 = vrcp.f32 %v86_v40 }
 0x113   :  { %v124_v41 = vpop.eup %123 }
 0x114   :  { %114 = vpush %v124_v41 }
 0x145   :  { %s115_s24 = spop %114 }
 0x146   :  { %s89_s25 = smul.f32 %s115_s24, %s84_s22 }
 0x148   :  { %s217_s23 = smov (!%p82_p10, %s83_s23), %s89_s25 }
 0x149   :  { %92 = sst [smem:[#allocation7]] %s217_s23 }
 0x14a   :  { %100 = dma.smem_to_hbm %s183_s26, 16, %s215_s2, [#allocation4]  }
 0x14b   :  { %177 = dma.done.wait [#allocation4], 16  }
 0x14c   :  { %178 = vsyncadd [#allocation4], 4294967280 }
 0x14d   :  { %104 = sfence }
 0x14e   :  { %105 = vsyncpa [#allocation3], 1 }
 0x14f   :  { %106 = vsyncpa [#allocation6], 1 }
 0x150   :  { %107 = vsyncpa [#allocation4], 1 }

</bundles_post_ra>
